<compile_context>
chip_gen: v7x
topology: tpu7x:2x2x1
jax: 0.10.0
libtpu: 0.0.40
codegen_flags: <defaults>
</compile_context>

<pallas_src>
import jax
import jax.numpy as jnp
from jax.experimental import pallas as pl
from jax.experimental.pallas import tpu as pltpu


# ----------------------------------------------------------------------------
# helpers
# ----------------------------------------------------------------------------
def _round_up(v: int, m: int) -> int:
    return (v + m - 1) // m * m


def _clip_tile(dim: int, granule: int, cap: int) -> int:
    """Largest granule-multiple tile <= min(cap, round_up(dim, granule))."""
    t = min(cap, _round_up(dim, granule))
    return max(granule, (t // granule) * granule)


def _pad2(a, rows, cols):
    r, c = a.shape
    if (r, c) == (rows, cols):
        return a
    return jnp.pad(a, ((0, rows - r), (0, cols - c)))


# ----------------------------------------------------------------------------
# kernels
# ----------------------------------------------------------------------------
def _enc_kernel(x_ref, bd_ref, w_ref, be_ref, o_ref):
    """One (i, n) tile of  encoded = (x - dec_b) @ enc_W^T + enc_b.

    K (in_feats) is fully resident, so each step is a single MXU dot with the
    bias subtract/add fused as cheap VPU work."""
    x_inp = x_ref[...] - bd_ref[...]                       # (tm, Dp) - (1, Dp)
    o_ref[...] = (
        jnp.dot(x_inp, w_ref[...], preferred_element_type=jnp.float32)
        + be_ref[...]
    ).astype(o_ref.dtype)


def _dec_kernel(h_ref, w_ref, bd_ref, o_ref):
    """One (i, k) step of  decoded = encoded @ dec_W^T + dec_b.

    The (tm, Dp) output block is resident across the K axis and doubles as
    the f32 accumulator (output dtype is f32)."""
    k = pl.program_id(1)

    @pl.when(k == 0)
    def _init():
        o_ref[...] = jnp.zeros_like(o_ref)

    o_ref[...] += jnp.dot(h_ref[...], w_ref[...],
                          preferred_element_type=jnp.float32)

    @pl.when(k == pl.num_programs(1) - 1)
    def _finalize():
        o_ref[...] = o_ref[...] + bd_ref[...]


# ----------------------------------------------------------------------------
# wrapper
# ----------------------------------------------------------------------------
def sparse_autoenc_noact(x, enc_w, enc_b, dec_w, dec_b, *,
                         max_tm=512, max_tf=1024,
                         vmem_budget_bytes=40 << 20):
    """Forward pass of Sparse_AutoEnc_NoAct.

    Args:
      x:     (B, in_feats)
      enc_w: (out_feats, in_feats)   -- torch nn.Linear layout
      enc_b: (out_feats,)
      dec_w: (in_feats, out_feats)   -- torch layout, rows L2-normalized
      dec_b: (in_feats,)
    Returns:
      (decoded (B, in_feats) f32, encoded (B, out_feats) f32, x)
    """
    x_orig = x
    f32 = jnp.float32
    x = x.astype(f32)

    B, D = x.shape
    F = enc_w.shape[0]

    Dp = _round_up(D, 128)                 # in_feats: lane axis, fully resident
    tm = _clip_tile(B, 8, max_tm)          # batch tile
    tf = _clip_tile(F, 128, max_tf)        # out_feats tile (enc N == dec K)

    # Double-buffered f32 working set of each call (bytes); shrink tiles until
    # both fit the per-generation VMEM budget (v7x: 64 MiB physical).
    def _vmem_bytes(tm_, tf_):
        enc = 8 * (tm_ * Dp + Dp * tf_ + tm_ * tf_ + Dp + tf_)
        dec = 8 * (tm_ * tf_ + tf_ * Dp + tm_ * Dp + Dp)
        return max(enc, dec)

    while _vmem_bytes(tm, tf) > vmem_budget_bytes and (tm > 8 or tf > 128):
        if tf >= tm and tf > 128:
            tf = max(128, _round_up(tf // 2, 128))
        elif tm > 8:
            tm = max(8, _round_up(tm // 2, 8))
        else:
            break

    Bp = _round_up(B, tm)
    Fp = _round_up(F, tf)

    # Pad + pre-transpose weights once (amortized across all batch tiles) so
    # the in-kernel contraction is canonical (M,K)@(K,N).  Zero padding is
    # exact: padded K columns contribute 0, padded rows/cols are sliced off.
    x_p = _pad2(x, Bp, Dp)
    bd_p = _pad2(dec_b.reshape(1, -1).astype(f32), 1, Dp)
    we_t = _pad2(jnp.transpose(enc_w.astype(f32)), Dp, Fp)   # (in, out)
    be_p = _pad2(enc_b.reshape(1, -1).astype(f32), 1, Fp)
    wd_t = _pad2(jnp.transpose(dec_w.astype(f32)), Fp, Dp)   # (out, in)

    vmem_limit = pltpu.CompilerParams(
        dimension_semantics=("parallel", "parallel"),
        vmem_limit_bytes=48 << 20,
    )

    # ---------------- encoder: (x - dec_b) @ enc_W^T + enc_b ----------------
    encoded_p = pl.pallas_call(
        _enc_kernel,
        out_shape=jax.ShapeDtypeStruct((Bp, Fp), f32),
        grid_spec=pltpu.PrefetchScalarGridSpec(
            num_scalar_prefetch=0,
            grid=(Bp // tm, Fp // tf),
            in_specs=[
                pl.BlockSpec((tm, Dp), lambda i, n: (i, 0)),  # x (resident over n)
                pl.BlockSpec((1, Dp), lambda i, n: (0, 0)),   # dec bias (subtract)
                pl.BlockSpec((Dp, tf), lambda i, n: (0, n)),  # enc W^T  (K, N)
                pl.BlockSpec((1, tf), lambda i, n: (0, n)),   # enc bias
            ],
            out_specs=pl.BlockSpec((tm, tf), lambda i, n: (i, n)),
        ),
        compiler_params=vmem_limit,
        cost_estimate=pl.CostEstimate(
            flops=2 * Bp * Dp * Fp,
            transcendentals=0,
            bytes_accessed=4 * (Bp * Dp + (Bp // tm) * Dp * Fp
                                + Bp * Fp + Dp + Fp),
        ),
    )(x_p, bd_p, we_t, be_p)

    # ---------------- decoder: encoded @ dec_W^T + dec_b --------------------
    decoded_p = pl.pallas_call(
        _dec_kernel,
        out_shape=jax.ShapeDtypeStruct((Bp, Dp), f32),
        grid_spec=pltpu.PrefetchScalarGridSpec(
            num_scalar_prefetch=0,
            grid=(Bp // tm, Fp // tf),
            in_specs=[
                pl.BlockSpec((tm, tf), lambda i, k: (i, k)),  # encoded (read once)
                pl.BlockSpec((tf, Dp), lambda i, k: (k, 0)),  # dec W^T  (K, N)
                pl.BlockSpec((1, Dp), lambda i, k: (0, 0)),   # dec bias
            ],
            out_specs=pl.BlockSpec((tm, Dp), lambda i, k: (i, 0)),  # resident acc
        ),
        compiler_params=pltpu.CompilerParams(
            dimension_semantics=("parallel", "arbitrary"),
            vmem_limit_bytes=48 << 20,
        ),
        cost_estimate=pl.CostEstimate(
            flops=2 * Bp * Fp * Dp,
            transcendentals=0,
            bytes_accessed=4 * (Bp * Fp + (Bp // tm) * Fp * Dp
                                + Bp * Dp + Dp),
        ),
    )(encoded_p, wd_t, bd_p)

    encoded = encoded_p[:B, :F]
    decoded = decoded_p[:B, :D]
    return decoded, encoded, x_orig


# ----------------------------------------------------------------------------
# test harness
# ----------------------------------------------------------------------------
def _init_params(key, in_feats, out_feats):
    """nn.Linear-style init (uniform +/- 1/sqrt(fan_in)); decoder rows
    L2-normalized along dim=1 as in the module."""
    k1, k2, k3, k4 = jax.random.split(key, 4)
    be_bound = 1.0 / jnp.sqrt(in_feats)
    bd_bound = 1.0 / jnp.sqrt(out_feats)
    enc_w = jax.random.uniform(k1, (out_feats, in_feats), jnp.float32,
                               -be_bound, be_bound)
    enc_b = jax.random.uniform(k2, (out_feats,), jnp.float32,
                               -be_bound, be_bound)
    dec_w = jax.random.uniform(k3, (in_feats, out_feats), jnp.float32,
                               -bd_bound, bd_bound)
    dec_b = jax.random.uniform(k4, (in_feats,), jnp.float32,
                               -bd_bound, bd_bound)
    dec_w = dec_w / jnp.maximum(
        jnp.linalg.norm(dec_w, axis=1, keepdims=True), 1e-12)
    return enc_w, enc_b, dec_w, dec_b


def _check(key, batch, in_feats, out_feats, **tile_kwargs):
    kx, kp = jax.random.split(key)
    x = jax.random.normal(kx, (batch, in_feats), jnp.float32)
    enc_w, enc_b, dec_w, dec_b = _init_params(kp, in_feats, out_feats)

    decoded, encoded, x_out = jax.block_until_ready(
        sparse_autoenc_noact(x, enc_w, enc_b, dec_w, dec_b, **tile_kwargs))

    # Pure-JAX reference.
    x_inp_ref = x - dec_b
    enc_ref = x_inp_ref @ enc_w.T + enc_b
    dec_ref = enc_ref @ dec_w.T + dec_b
    assert jnp.allclose(encoded, enc_ref, atol=1e-4, rtol=1e-4), "encoded mismatch"
    assert jnp.allclose(decoded, dec_ref, atol=1e-4, rtol=1e-4), "decoded mismatch"
    assert jnp.array_equal(x_out, x), "x passthrough mismatch"


if __name__ == "__main__":
    key = jax.random.PRNGKey(0)
    k1, k2 = jax.random.split(key)
    # Non-aligned small shapes: exercises the 8/128 padding path.
    _check(k1, batch=6, in_feats=40, out_feats=72)
    # Aligned shapes with forced small tiles: exercises the multi-tile grid,
    # the resident x / encoded slabs, and the decoder's in-place K reduction.
    _check(k2, batch=64, in_feats=256, out_feats=512, max_tm=32, max_tf=128)
    print("KERNEL_OK")
</pallas_src>

<mosaic_0001>
module attributes {stable_mosaic.version = 11 : i64} {
  func.func @_enc_kernel(%arg0: i32, %arg1: i32, %arg2: memref<8x128xf32, #tpu.memory_space<vmem>>, %arg3: memref<1x128xf32, #tpu.memory_space<vmem>>, %arg4: memref<128x128xf32, #tpu.memory_space<vmem>>, %arg5: memref<1x128xf32, #tpu.memory_space<vmem>>, %arg6: memref<8x128xf32, #tpu.memory_space<vmem>>) attributes {dimension_semantics = [#tpu.dimension_semantics<parallel>, #tpu.dimension_semantics<parallel>], iteration_bounds = array<i64: 1, 1>, scalar_prefetch = 0 : i64, scratch_operands = 0 : i64, tpu.core_type = #tpu.core_type<tc>, window_params = [{transform_indices = @transform_0, window_bounds = array<i64: 8, 128>}, {pipeline_mode = #tpu.pipeline_mode<synchronous>, transform_indices = @transform_1, window_bounds = array<i64: 1, 128>}, {transform_indices = @transform_2, window_bounds = array<i64: 128, 128>}, {transform_indices = @transform_3, window_bounds = array<i64: 1, 128>}, {transform_indices = @transform_4, window_bounds = array<i64: 8, 128>}]} {
    %c0 = arith.constant 0 : index
    %c0_0 = arith.constant 0 : index
    %0 = vector.load %arg2[%c0, %c0_0] : memref<8x128xf32, #tpu.memory_space<vmem>>, vector<8x128xf32>
    %c0_1 = arith.constant 0 : index
    %c0_2 = arith.constant 0 : index
    %1 = vector.load %arg3[%c0_1, %c0_2] : memref<1x128xf32, #tpu.memory_space<vmem>>, vector<1x128xf32>
    %2 = vector.broadcast %1 : vector<1x128xf32> to vector<8x128xf32>
    %3 = arith.subf %0, %2 : vector<8x128xf32>
    %c0_3 = arith.constant 0 : index
    %c0_4 = arith.constant 0 : index
    %4 = vector.load %arg4[%c0_3, %c0_4] : memref<128x128xf32, #tpu.memory_space<vmem>>, vector<128x128xf32>
    %cst = arith.constant dense<0.000000e+00> : vector<8x128xf32>
    %5 = tpu.matmul %3, %4, %cst {dimension_numbers = #tpu.dot_dimension_numbers<[1], [0], [0], [1], [0, 0, 1, 1], [], []>} : vector<8x128xf32>, vector<128x128xf32>, vector<8x128xf32> -> vector<8x128xf32>
    %c0_5 = arith.constant 0 : index
    %c0_6 = arith.constant 0 : index
    %6 = vector.load %arg5[%c0_5, %c0_6] : memref<1x128xf32, #tpu.memory_space<vmem>>, vector<1x128xf32>
    %7 = vector.broadcast %6 : vector<1x128xf32> to vector<8x128xf32>
    %8 = arith.addf %5, %7 : vector<8x128xf32>
    %c0_7 = arith.constant 0 : index
    %c0_8 = arith.constant 0 : index
    %9 = vector.load %arg6[%c0_7, %c0_8] : memref<8x128xf32, #tpu.memory_space<vmem>>, vector<8x128xf32>
    tpu.vector_store %arg6[%c0_7, %c0_8], %8 {strides = array<i32>} : memref<8x128xf32, #tpu.memory_space<vmem>>, vector<8x128xf32>,
    return
  }
  func.func @transform_0(%arg0: i32, %arg1: i32) -> (i32, i32) {
    %c0_i32 = arith.constant 0 : i32
    %c0_i32_0 = arith.constant 0 : i32
    return %arg0, %c0_i32 : i32, i32
  }
  func.func @transform_1(%arg0: i32, %arg1: i32) -> (i32, i32) {
    %c0_i32 = arith.constant 0 : i32
    %c0_i32_0 = arith.constant 0 : i32
    %c0_i32_1 = arith.constant 0 : i32
    return %c0_i32, %c0_i32_0 : i32, i32
  }
  func.func @transform_2(%arg0: i32, %arg1: i32) -> (i32, i32) {
    %c0_i32 = arith.constant 0 : i32
    %c0_i32_0 = arith.constant 0 : i32
    return %c0_i32, %arg1 : i32, i32
  }
  func.func @transform_3(%arg0: i32, %arg1: i32) -> (i32, i32) {
    %c0_i32 = arith.constant 0 : i32
    %c0_i32_0 = arith.constant 0 : i32
    return %c0_i32, %arg1 : i32, i32
  }
  func.func @transform_4(%arg0: i32, %arg1: i32) -> (i32, i32) {
    %c0_i32 = arith.constant 0 : i32
    return %arg0, %arg1 : i32, i32
  }
}

</mosaic_0001>

<bundles_post_ra>
// kernel: tpu_custom_call.1
= control target key start
LH: loop header
LB: loop body
LE: loop exit
PB: predicated region body
PF: predicated region fallthrough
CT: control target
= control target key end

     0   :  { %9 = vsyncpa [#allocation3], 0  ;;  %s403_s0 = inlined_call_operand.hbm [shape: f32[8,128], index: 0, kind: input, shape index: {}]   ;;  %s404_s1 = inlined_call_operand.vmem [shape: f32[1,128], index: 1, kind: input, shape index: {}]   ;;  %s405_s2 = inlined_call_operand.hbm [shape: f32[128,128], index: 2, kind: input, shape index: {}]   ;;  %s406_s3 = inlined_call_operand.vmem [shape: f32[1,128], index: 3, kind: input, shape index: {}]   ;;  %s407_s4 = inlined_call_operand.hbm [shape: f32[8,128], index: 4, kind: output, shape index: {}]  }
   0x1   :  { %10 = vsyncpa [#allocation6], 0 }
   0x2   :  { %11 = vsyncpa [#allocation4], 0  ;;  %s321_s15 = smov [#allocation2]   ;;  %s322_s17 = smov [#allocation5]  }
   0x3   :  { %s18_s16 = sshll.u32 %s321_s15, 4  ;;  %s29_s18 = sshll.u32 %s322_s17, 4  ;;  %s19_s16 = int_to_ptr.vmem [resolvable:$true] %s18_s16  ;;  %s354_s18 = int_to_ptr.vmem [resolvable:$true] %s29_s18 }
   0x4   :  { %s249_s21 = scalar_lea.hbm %s403_s0, 128 }
   0x5   :  { %p250_p0 = scmp.ne.s32.totalorder %s403_s0, %s249_s21  ;;  %p253_p1 = scmp.lt.u32.totalorder %s249_s21, %s403_s0 }
   0x7   :  { %p255_p2 = pnand %p253_p1, %p250_p0 }
   0x9   :  { %258 = shalt.err (!%p255_p2)
}
   0xa   :  { %s259_s26 = scalar_lea.vmem %s19_s16, 128  ;;  %p264_p4 = scmp.lt.s32.totalorder %s19_s16, %s19_s16 }
   0xb   :  { %p260_p3 = scmp.ne.s32.totalorder %s19_s16, %s259_s26  ;;  %p265_p5 = scmp.lt.s32.totalorder %s259_s26, %s259_s26 }
   0xd   :  { %p266_p6 = por %p265_p5, %p264_p4 }
   0xf   :  { %p267_p7 = pnand %p266_p6, %p260_p3 }
  0x11   :  { %270 = shalt.err (!%p267_p7)
}
  0x12   :  { %21 = dma.hbm_to_vmem [thread:$0]  %s403_s0, 128, %s19_s16, [#allocation3]  }
  0x13   :  { %s271_s5 = scalar_lea.hbm %s405_s2, 2048 }
  0x14   :  { %p272_p8 = scmp.ne.s32.totalorder %s405_s2, %s271_s5  ;;  %p275_p9 = scmp.lt.u32.totalorder %s271_s5, %s405_s2 }
  0x16   :  { %p277_p10 = pnand %p275_p9, %p272_p8 }
  0x18   :  { %280 = shalt.err (!%p277_p10)
}
  0x19   :  { %s281_s10 = scalar_lea.vmem %s354_s18, 2048  ;;  %p286_p12 = scmp.lt.s32.totalorder %s354_s18, %s354_s18 }
  0x1a   :  { %p282_p11 = scmp.ne.s32.totalorder %s354_s18, %s281_s10  ;;  %p287_p13 = scmp.lt.s32.totalorder %s281_s10, %s281_s10 }
  0x1c   :  { %p288_p0 = por %p287_p13, %p286_p12 }
  0x1e   :  { %p289_p1 = pnand %p288_p0, %p282_p11 }
  0x20   :  { %292 = shalt.err (!%p289_p1)
}
  0x21   :  { %s323_s0 = smov 128   ;;  %s324_s11 = smov 8  }
  0x22   :  { %35 = dma.hbm_to_vmem [thread:$0]  %s405_s2, 2048, %s354_s18, [#allocation6], %s323_s0, %s323_s0, %s324_s11  }
  0x23   :  { %315 = dma.done.wait [#allocation3], 128  }
  0x24   :  { %316 = vsyncadd [#allocation3], 4294967168 }
  0x25   :  { %317 = dma.done.wait [#allocation6], 2048  }
  0x26   :  { %318 = vsyncadd [#allocation6], 4294965248  ;;  %v325_v0 = vmov 0.0|0.0   ;;  %vm326_vm0 = vmmov 0   ;;  %v327_v1 = vmov 0.0   ;;  %v53_v2 = vld [vmem:[#allocation5] sm:$0xff] }
  0x27   :  { %217 = vmatprep.subr.bf16.mxu0 %v325_v0  ;;  %214 = vmatprep.mubr.msk.f32.mxu0 %vm326_vm0, %v327_v1  ;;  %v54_v3 = vld [vmem:[#allocation5 + $0x8] sm:$0xff]  ;;  %v55_v4 = vld [vmem:[#allocation5 + $0x10] sm:$0xff]  ;;  %v56_v6 = vld [vmem:[#allocation5 + $0x18] sm:$0xff]  ;;  %s328_s17 = smov [#allocation7]  }
  0x28   :  { %v218_v5 = vpack.c.bf16 %v54_v3, %v53_v2  ;;  %v221_v7 = vpack.c.bf16 %v56_v6, %v55_v4  ;;  %v57_v8 = vld [vmem:[#allocation5 + $0x20] sm:$0xff]  ;;  %v58_v9 = vld [vmem:[#allocation5 + $0x28] sm:$0xff]  ;;  %v59_v11 = vld [vmem:[#allocation5 + $0x30] sm:$0xff]  ;;  %s153_s18 = sshll.u32 %s328_s17, 4  ;;  %s154_s18 = int_to_ptr.vmem [resolvable:$true] %s153_s18 }
  0x29   :  { %v224_v10 = vpack.c.bf16 %v58_v9, %v57_v8  ;;  %v60_v12 = vld [vmem:[#allocation5 + $0x38] sm:$0xff]  ;;  %v61_v14 = vld [vmem:[#allocation5 + $0x40] sm:$0xff]  ;;  %v62_v15 = vld [vmem:[#allocation5 + $0x48] sm:$0xff]  ;;  %s293_s19 = scalar_lea.vmem %s154_s18, 128  ;;  %p298_p3 = scmp.lt.s32.totalorder %s154_s18, %s154_s18 }
  0x2a   :  { %219 = vmatpush3.bf16.msra.mxu0 %v218_v5  ;;  %v227_v13 = vpack.c.bf16 %v60_v12, %v59_v11  ;;  %v230_v16 = vpack.c.bf16 %v62_v15, %v61_v14  ;;  %v63_v17 = vld [vmem:[#allocation5 + $0x50] sm:$0xff]  ;;  %v64_v18 = vld [vmem:[#allocation5 + $0x58] sm:$0xff]  ;;  %v65_v20 = vld [vmem:[#allocation5 + $0x60] sm:$0xff]  ;;  %p294_p2 = scmp.ne.s32.totalorder %s154_s18, %s293_s19  ;;  %p299_p4 = scmp.lt.s32.totalorder %s293_s19, %s293_s19 }
  0x2b   :  { %220 = vmatprep.subr.bf16.mxu0 %v325_v0  ;;  %v233_v19 = vpack.c.bf16 %v64_v18, %v63_v17  ;;  %v66_v21 = vld [vmem:[#allocation5 + $0x68] sm:$0xff]  ;;  %v67_v23 = vld [vmem:[#allocation5 + $0x70] sm:$0xff]  ;;  %v68_v24 = vld [vmem:[#allocation5 + $0x78] sm:$0xff] }
  0x2c   :  { %v236_v22 = vpack.c.bf16 %v66_v21, %v65_v20  ;;  %v239_v25 = vpack.c.bf16 %v68_v24, %v67_v23  ;;  %v44_v26 = vld [vmem:[#allocation2] sm:$0xff]  ;;  %p300_p5 = por %p299_p4, %p298_p3 }
  0x2d   :  { %v163_v27 = vld [vmem:[%s404_s1] ss:$0 sm:$0xff] }
  0x2e   :  { %222 = vmatpush3.bf16.msra.mxu0 %v221_v7  ;;  %v52_v28 = vsub.f32 %v44_v26, %v163_v27  ;;  %v164_v29 = vld [vmem:[%s406_s3] ss:$0 sm:$0xff]  ;;  %p301_p6 = pnand %p300_p5, %p294_p2 }
  0x2f   :  { %223 = vmatprep.subr.bf16.mxu0 %v325_v0 }
  0x32   :  { %225 = vmatpush3.bf16.msra.mxu0 %v224_v10 }
  0x33   :  { %226 = vmatprep.subr.bf16.mxu0 %v325_v0 }
  0x36   :  { %228 = vmatpush3.bf16.msra.mxu0 %v227_v13 }
  0x37   :  { %229 = vmatprep.subr.bf16.mxu0 %v325_v0 }
  0x3a   :  { %231 = vmatpush3.bf16.msra.mxu0 %v230_v16 }
  0x3b   :  { %232 = vmatprep.subr.bf16.mxu0 %v325_v0 }
  0x3e   :  { %234 = vmatpush3.bf16.msra.mxu0 %v233_v19 }
  0x3f   :  { %235 = vmatprep.subr.bf16.mxu0 %v325_v0 }
  0x42   :  { %237 = vmatpush3.bf16.msra.mxu0 %v236_v22 }
  0x43   :  { %238 = vmatprep.subr.bf16.mxu0 %v325_v0 }
  0x46   :  { %240 = vmatpush3.bf16.msra.mxu0 %v239_v25 }
  0x49   :  { %215 = vmatmul.mubr.f32.vlgmr.msra.gmra.mrb[0].mxu0 %v52_v28 }
 0x11c   :  { %v142_v30 = vpop.f32.mrb[0].mxu0 }
 0x11d   :  { %v143_v31 = vadd.f32 %v164_v29, %v142_v30  ;;  %v216_v32 = vpop.f32.mrb[1].mxu0 }
 0x11f   :  { %146 = vst [vmem:[#allocation7] sm:$0xff] %v143_v31 }
 0x120   :  { %304 = shalt.err (!%p301_p6)
}
 0x121   :  { %s305_s21 = scalar_lea.hbm %s407_s4, 128 }
 0x122   :  { %p306_p7 = scmp.ne.s32.totalorder %s407_s4, %s305_s21  ;;  %p309_p8 = scmp.lt.u32.totalorder %s305_s21, %s407_s4 }
 0x124   :  { %p311_p9 = pnand %p309_p8, %p306_p7 }
 0x126   :  { %314 = shalt.err (!%p311_p9)
}
 0x127   :  { %156 = dma.vmem_to_hbm [thread:$0]  %s154_s18, 128, %s407_s4, [#allocation4]  }
 0x128   :  { %319 = dma.done.wait [#allocation4], 128  }
 0x129   :  { %320 = vsyncadd [#allocation4], 4294967168 }
 0x12a   :  { %160 = vsyncpa [#allocation3], 1 }
 0x12b   :  { %161 = vsyncpa [#allocation6], 1 }
 0x12c   :  { %162 = vsyncpa [#allocation4], 1 }

</bundles_post_ra>
